<compile_context>
chip_gen: v6e
topology: v6e:2x2x1
jax: 0.10.0
libtpu: 0.0.40
codegen_flags: <defaults>
</compile_context>

<pallas_src>
import functools
import math

import jax
import jax.numpy as jnp
from jax import lax
from jax.experimental import pallas as pl
from jax.experimental.pallas import tpu as pltpu


def _cdiv(a: int, b: int) -> int:
    return (a + b - 1) // b


def _round_up(x: int, m: int) -> int:
    return _cdiv(x, m) * m


def _make_kernel(*, add_bias: bool, use_acc: bool, nt_weight: bool,
                 k_rem: int, nk: int):
    """Build the tiled matmul kernel.

    Ref layout (per grid step):
      x_ref  : (tm, tk)                activation tile
      w_ref  : (tn, tk) if nt_weight   weight tile as stored [out, in]
               (tk, tn) otherwise      pre-transposed [in, out] weight tile
      b_ref  : (1, tn)                 bias row tile        (only if add_bias)
      o_ref  : (tm, tn)                output tile (resident across k)
      acc_ref: (tm, tn) f32 scratch    (only if use_acc; else o_ref is the acc)
    """
    dn = (((1,), (1,)), ((), ())) if nt_weight else (((1,), (0,)), ((), ()))
    k_axis_w = 1 if nt_weight else 0

    def kernel(*refs):
        idx = 0
        x_ref = refs[idx]; idx += 1
        w_ref = refs[idx]; idx += 1
        b_ref = None
        if add_bias:
            b_ref = refs[idx]; idx += 1
        o_ref = refs[idx]; idx += 1
        acc_ref = refs[idx] if use_acc else o_ref

        k = pl.program_id(2)
        last = nk - 1

        @pl.when(k == 0)
        def _init():
            acc_ref[...] = jnp.zeros_like(acc_ref)

        def _dot(x, w):
            return lax.dot_general(
                x, w, dimension_numbers=dn,
                preferred_element_type=jnp.float32,
            )

        def _masked_dot():
            # Zero the invalid K tail of BOTH operands so garbage (even
            # NaN/Inf) in the unspecified OOB region contributes exactly 0.
            kx = lax.broadcasted_iota(jnp.int32, x_ref.shape, 1) < k_rem
            kw = lax.broadcasted_iota(jnp.int32, w_ref.shape, k_axis_w) < k_rem
            x = jnp.where(kx, x_ref[...], 0)
            w = jnp.where(kw, w_ref[...], 0)
            acc_ref[...] += _dot(x, w)

        def _plain_dot():
            acc_ref[...] += _dot(x_ref[...], w_ref[...])

        if k_rem == 0:
            _plain_dot()
        elif nk == 1:
            _masked_dot()
        else:
            pl.when(k == last)(_masked_dot)
            pl.when(k != last)(_plain_dot)

        if add_bias or use_acc:
            @pl.when(k == last)
            def _epilogue():
                acc = acc_ref[...]
                if add_bias:
                    acc = acc + b_ref[...].astype(jnp.float32)
                o_ref[...] = acc.astype(o_ref.dtype)

    return kernel


@functools.partial(
    jax.jit,
    static_argnames=("tm", "tn", "tk", "skip_bias_add", "weight_is_transposed",
                     "compute_dtype"),
)
def unaligned_column_parallel_linear_fwd(
    input_, weight, bias=None, *,
    tm: int = 512, tn: int = 1024, tk: int = 512,
    skip_bias_add: bool = False,
    weight_is_transposed: bool = False,
    compute_dtype=None,
):
    """Forward of UnalignedColumnParallelLinear (single TP rank).

    input_: [..., input_size]                 (e.g. [seq, batch, input_size])
    weight: [output_size, input_size]         (as stored by the module), or
            [input_size, output_size] if weight_is_transposed=True
    bias:   [output_size] or None
    returns (output [..., output_size], output_bias)
    """
    lead = input_.shape[:-1]
    K = input_.shape[-1]
    M = int(math.prod(lead)) if lead else 1
    if weight_is_transposed:
        Kw, N = weight.shape
    else:
        N, Kw = weight.shape
    if K != Kw:
        raise ValueError("weight shape does not match input_size")

    out_dtype = input_.dtype
    in_dtype = jnp.dtype(compute_dtype) if compute_dtype is not None \
        else jnp.dtype(input_.dtype)

    x2d = input_.reshape(M, K)
    w2d = weight
    if compute_dtype is not None:
        x2d = x2d.astype(in_dtype)
        w2d = w2d.astype(in_dtype)

    add_bias = (bias is not None) and (not skip_bias_add)

    # dtype-aware sublane packing: 8 rows (4B), 16 (2B), 32 (1B)
    sublane = max(8, 32 // jnp.dtype(in_dtype).itemsize)

    tm_e = min(tm, _round_up(M, sublane))
    tn_e = min(tn, _round_up(N, 128))
    tk_e = min(tk, _round_up(K, 128))

    grid_m = _cdiv(M, tm_e)
    grid_n = _cdiv(N, tn_e)
    grid_k = _cdiv(K, tk_e)

    # v7x megacore: keep >=2 programs on the parallel axes (prefer splitting N).
    if grid_m * grid_n < 2:
        n128 = _cdiv(N, 128)
        if n128 >= 2:
            tn_e = _cdiv(n128, 2) * 128
            grid_n = _cdiv(N, tn_e)

    k_rem = K % tk_e                      # 0 -> no in-kernel K-tail mask
    use_acc = (jnp.dtype(out_dtype) != jnp.dtype(jnp.float32))

    kernel = _make_kernel(add_bias=add_bias, use_acc=use_acc,
                          nt_weight=not weight_is_transposed,
                          k_rem=k_rem, nk=grid_k)

    # --- specs & operands --------------------------------------------------
    x_spec = pl.BlockSpec((tm_e, tk_e), lambda i, j, k: (i, k))
    if weight_is_transposed:
        w_spec = pl.BlockSpec((tk_e, tn_e), lambda i, j, k: (k, j))
    else:
        w_spec = pl.BlockSpec((tn_e, tk_e), lambda i, j, k: (j, k))
    in_specs = [x_spec, w_spec]
    operands = [x2d, w2d]
    if add_bias:
        in_specs.append(pl.BlockSpec((1, tn_e), lambda i, j, k: (0, j)))
        operands.append(bias.reshape(1, N))
    out_spec = pl.BlockSpec((tm_e, tn_e), lambda i, j, k: (i, j))
    scratch = [pltpu.VMEM((tm_e, tn_e), jnp.float32)] if use_acc else []

    # --- VMEM budget (double-buffered tiles + accumulator, with headroom) ---
    in_bytes = jnp.dtype(in_dtype).itemsize
    out_bytes = jnp.dtype(out_dtype).itemsize
    tile_bytes = (tm_e * tk_e + tn_e * tk_e) * in_bytes + tm_e * tn_e * out_bytes
    if add_bias:
        tile_bytes += tn_e * jnp.dtype(bias.dtype).itemsize
    acc_bytes = tm_e * tn_e * 4 if use_acc else 0
    needed = 2 * tile_bytes + acc_bytes
    try:
        info = pltpu.get_tpu_info()
        phys_vmem = int(getattr(info, "vmem_capacity_bytes", 64 * 1024 * 1024))
    except Exception:
        phys_vmem = 64 * 1024 * 1024      # conservative (v7x per-TC VMEM)
    vmem_limit = int(min(max(needed * 3 // 2, 32 * 1024 * 1024),
                         (phys_vmem * 3) // 4))

    # --- cost estimate reflecting actual streaming --------------------------
    cost = pl.CostEstimate(
        flops=2 * M * N * K,
        transcendentals=0,
        bytes_accessed=(M * K * grid_n + N * K * grid_m) * in_bytes
        + M * N * out_bytes,
    )

    out2d = pl.pallas_call(
        kernel,
        out_shape=jax.ShapeDtypeStruct((M, N), out_dtype),
        grid_spec=pltpu.PrefetchScalarGridSpec(
            num_scalar_prefetch=0,
            grid=(grid_m, grid_n, grid_k),
            in_specs=in_specs,
            out_specs=out_spec,
            scratch_shapes=scratch,
        ),
        compiler_params=pltpu.CompilerParams(
            dimension_semantics=("parallel", "parallel", "arbitrary"),
            vmem_limit_bytes=vmem_limit,
        ),
        cost_estimate=cost,
    )(*operands)

    output = out2d.reshape(*lead, N)
    output_bias = bias if skip_bias_add else None
    # TODO(synk): world_size > 1 paths (copy_to/gather_from tensor-parallel
    # region, sequence parallel, grad-accumulation fusion) are distributed /
    # backward-pass features with no single-kernel Pallas equivalent here.
    return output, output_bias


if __name__ == "__main__":
    key = jax.random.PRNGKey(0)

    def ref_linear(x, w_nk, b):
        out = jnp.einsum("...k,nk->...n",
                         x.astype(jnp.float32), w_nk.astype(jnp.float32),
                         precision=lax.Precision.HIGHEST)
        if b is not None:
            out = out + b.astype(jnp.float32)
        return out

    # --- case 1: aligned shapes, f32 ---------------------------------------
    seq, batch, in_sz, out_sz = 8, 2, 128, 256
    k1, k2, key = jax.random.split(key, 3)
    x = jax.random.normal(k1, (seq, batch, in_sz), dtype=jnp.float32)
    w = 0.02 * jax.random.normal(k2, (out_sz, in_sz), dtype=jnp.float32)
    b = jnp.zeros((out_sz,), dtype=jnp.float32)   # module zero-inits bias

    out, out_bias = unaligned_column_parallel_linear_fwd(x, w, b)
    out = jax.block_until_ready(out)
    assert out.shape == (seq, batch, out_sz) and out_bias is None
    assert jnp.allclose(out, ref_linear(x, w, b), atol=2e-2, rtol=2e-2)

    # --- case 2: unaligned shapes (K-tail mask + dropped OOB M/N), f32 ------
    seq2, batch2, in2, out2_sz = 7, 2, 96, 200
    k3, k4, k5, key = jax.random.split(key, 4)
    x2 = jax.random.normal(k3, (seq2, batch2, in2), dtype=jnp.float32)
    w2 = 0.02 * jax.random.normal(k4, (out2_sz, in2), dtype=jnp.float32)
    b2 = 0.01 * jax.random.normal(k5, (out2_sz,), dtype=jnp.float32)

    out2, _ = unaligned_column_parallel_linear_fwd(x2, w2, b2)
    out2 = jax.block_until_ready(out2)
    assert out2.shape == (seq2, batch2, out2_sz)
    assert jnp.allclose(out2, ref_linear(x2, w2, b2), atol=2e-2, rtol=2e-2)

    # --- case 3: bf16 compute + load-time-transposed [K, N] weight ----------
    w_t = jnp.asarray(w.T)   # one-time, parameter-load-style transpose
    out3, _ = unaligned_column_parallel_linear_fwd(
        x, w_t, b, weight_is_transposed=True, compute_dtype=jnp.bfloat16)
    out3 = jax.block_until_ready(out3)
    assert out3.shape == (seq, batch, out_sz) and out3.dtype == x.dtype
    assert jnp.allclose(out3, ref_linear(x, w, b), atol=5e-2, rtol=5e-2)

    # --- case 4: skip_bias_add=True -> bias not added, returned separately --
    out4, bias4 = unaligned_column_parallel_linear_fwd(
        x2, w2, b2, skip_bias_add=True)
    out4 = jax.block_until_ready(out4)
    assert bias4 is not None and bias4.shape == (out2_sz,)
    assert jnp.allclose(out4, ref_linear(x2, w2, None), atol=2e-2, rtol=2e-2)

    print("KERNEL_OK")
</pallas_src>

<mosaic_0001>
module attributes {stable_mosaic.version = 11 : i64} {
  func.func @kernel(%arg0: i32, %arg1: i32, %arg2: i32, %arg3: memref<16x128xf32, #tpu.memory_space<vmem>>, %arg4: memref<128x128xf32, #tpu.memory_space<vmem>>, %arg5: memref<1x128xf32, #tpu.memory_space<vmem>>, %arg6: memref<16x128xf32, #tpu.memory_space<vmem>>) attributes {dimension_semantics = [#tpu.dimension_semantics<parallel>, #tpu.dimension_semantics<parallel>, #tpu.dimension_semantics<arbitrary>], iteration_bounds = array<i64: 1, 2, 1>, scalar_prefetch = 0 : i64, scratch_operands = 0 : i64, tpu.core_type = #tpu.core_type<tc>, window_params = [{transform_indices = @transform_0, window_bounds = array<i64: 16, 128>}, {transform_indices = @transform_1, window_bounds = array<i64: 128, 128>}, {transform_indices = @transform_2, window_bounds = array<i64: 1, 128>}, {transform_indices = @transform_3, window_bounds = array<i64: 16, 128>}]} {
    %c0_i32 = arith.constant 0 : i32
    %0 = arith.cmpi eq, %arg2, %c0_i32 : i32
    %1 = arith.extui %0 : i1 to i32
    %c0_i32_0 = arith.constant 0 : i32
    %2 = arith.cmpi ne, %1, %c0_i32_0 : i32
    scf.if %2 {
      %cst_10 = arith.constant 0.000000e+00 : f32
      %12 = vector.broadcast %cst_10 : f32 to vector<16x128xf32>
      %c0_11 = arith.constant 0 : index
      %c0_12 = arith.constant 0 : index
      %13 = vector.load %arg6[%c0_11, %c0_12] : memref<16x128xf32, #tpu.memory_space<vmem>>, vector<16x128xf32>
      tpu.vector_store %arg6[%c0_11, %c0_12], %12 {strides = array<i32>} : memref<16x128xf32, #tpu.memory_space<vmem>>, vector<16x128xf32>,
    } else {
    }
    %c0 = arith.constant 0 : index
    %c0_1 = arith.constant 0 : index
    %3 = vector.load %arg6[%c0, %c0_1] : memref<16x128xf32, #tpu.memory_space<vmem>>, vector<16x128xf32>
    %c0_2 = arith.constant 0 : index
    %c0_3 = arith.constant 0 : index
    %4 = vector.load %arg3[%c0_2, %c0_3] : memref<16x128xf32, #tpu.memory_space<vmem>>, vector<16x128xf32>
    %c0_4 = arith.constant 0 : index
    %c0_5 = arith.constant 0 : index
    %5 = vector.load %arg4[%c0_4, %c0_5] : memref<128x128xf32, #tpu.memory_space<vmem>>, vector<128x128xf32>
    %cst = arith.constant dense<0.000000e+00> : vector<16x128xf32>
    %6 = tpu.matmul %4, %5, %cst {dimension_numbers = #tpu.dot_dimension_numbers<[1], [1], [0], [0], [0, 0, 1, 0], [], []>} : vector<16x128xf32>, vector<128x128xf32>, vector<16x128xf32> -> vector<16x128xf32>
    %7 = arith.addf %3, %6 : vector<16x128xf32>
    %c0_6 = arith.constant 0 : index
    %c0_7 = arith.constant 0 : index
    %8 = vector.load %arg6[%c0_6, %c0_7] : memref<16x128xf32, #tpu.memory_space<vmem>>, vector<16x128xf32>
    tpu.vector_store %arg6[%c0_6, %c0_7], %7 {strides = array<i32>} : memref<16x128xf32, #tpu.memory_space<vmem>>, vector<16x128xf32>,
    %c0_i32_8 = arith.constant 0 : i32
    %9 = arith.cmpi eq, %arg2, %c0_i32_8 : i32
    %10 = arith.extui %9 : i1 to i32
    %c0_i32_9 = arith.constant 0 : i32
    %11 = arith.cmpi ne, %10, %c0_i32_9 : i32
    scf.if %11 {
      %c0_10 = arith.constant 0 : index
      %c0_11 = arith.constant 0 : index
      %12 = vector.load %arg6[%c0_10, %c0_11] : memref<16x128xf32, #tpu.memory_space<vmem>>, vector<16x128xf32>
      %c0_12 = arith.constant 0 : index
      %c0_13 = arith.constant 0 : index
      %13 = vector.load %arg5[%c0_12, %c0_13] : memref<1x128xf32, #tpu.memory_space<vmem>>, vector<1x128xf32>
      %14 = vector.broadcast %13 : vector<1x128xf32> to vector<16x128xf32>
      %15 = arith.addf %12, %14 : vector<16x128xf32>
      %c0_14 = arith.constant 0 : index
      %c0_15 = arith.constant 0 : index
      %16 = vector.load %arg6[%c0_14, %c0_15] : memref<16x128xf32, #tpu.memory_space<vmem>>, vector<16x128xf32>
      tpu.vector_store %arg6[%c0_14, %c0_15], %15 {strides = array<i32>} : memref<16x128xf32, #tpu.memory_space<vmem>>, vector<16x128xf32>,
    } else {
    }
    return
  }
  func.func @transform_0(%arg0: i32, %arg1: i32, %arg2: i32) -> (i32, i32) {
    %c0_i32 = arith.constant 0 : i32
    return %arg0, %arg2 : i32, i32
  }
  func.func @transform_1(%arg0: i32, %arg1: i32, %arg2: i32) -> (i32, i32) {
    %c0_i32 = arith.constant 0 : i32
    return %arg1, %arg2 : i32, i32
  }
  func.func @transform_2(%arg0: i32, %arg1: i32, %arg2: i32) -> (i32, i32) {
    %c0_i32 = arith.constant 0 : i32
    %c0_i32_0 = arith.constant 0 : i32
    return %c0_i32, %arg1 : i32, i32
  }
  func.func @transform_3(%arg0: i32, %arg1: i32, %arg2: i32) -> (i32, i32) {
    %c0_i32 = arith.constant 0 : i32
    return %arg0, %arg1 : i32, i32
  }
}

</mosaic_0001>

<bundles_post_ra>
// kernel: unaligned_column_parallel_linear_fwd.1
= control target key start
LH: loop header
LB: loop body
LE: loop exit
PB: predicated region body
PF: predicated region fallthrough
CT: control target
= control target key end

     0   :  { %8 = vsyncpa [#allocation3], 0  ;;  %s958_s0 = inlined_call_operand.hbm [shape: f32[16,128], index: 0, kind: input, shape index: {}]   ;;  %s959_s1 = inlined_call_operand.hbm [shape: f32[256,128], index: 1, kind: input, shape index: {}]   ;;  %s960_s2 = inlined_call_operand.vmem [shape: f32[1,256], index: 2, kind: input, shape index: {}]   ;;  %s961_s3 = inlined_call_operand.vmem [shape: f32[16,256], index: 3, kind: output, shape index: {}]  }
   0x1   :  { %9 = vsyncpa [#allocation5], 0 }
   0x2   :  { %11 = vsyncpa [#allocation5 + $0x1], 0  ;;  %s798_s12 = smov 0   ;;  %s800_s13 = smov 0  }
   0x3   :  { %s802_s14 = smov 0   ;;  %s804_s15 = smov 0  }
   0x4   :  { %s806_s16 = smov 0   ;;  %s808_s17 = smov 0  }
   0x5 LB: > { %s524_s18 = sadd.s32 4294967295, %s772_s17   ;;  %p86_p0 = scmp.ne.s32.totalorder %s756_s13, %s752_s12  ;;  %s772_s17 = sphi %s808_s17, %s17_s17   ;;  %s768_s16 = sphi %s806_s16, %s974_s16   ;;  %s764_s15 = sphi %s804_s15, %s973_s15   ;;  %s760_s14 = sphi %s802_s14, %s972_s14   ;;  %s756_s13 = sphi %s800_s13, %s971_s13   ;;  %s752_s12 = sphi %s798_s12, %s970_s12  }
   0x6   : > { %p828_p1 = scmp.eq.s32.totalorder %s524_s18, 0  ;;  %p832_p2 = scmp.eq.s32.totalorder %s524_s18, 1 }
   0x7   : > { %p526_p3 = scmp.ge.s32.totalorder %s772_s17, 1  ;;  %p151_p4 = scmp.lt.s32.totalorder %s772_s17, 3 }
   0x8   : > { %p840_p5 = por %p828_p1, %p86_p0  ;;  %s774_s23 = smov [#allocation2]  }
   0x9   : > { %p844_p6 = pnand %p526_p3, %p151_p4  ;;  %s167_s24 = sshll.u32 %s774_s23, 4  ;;  %s168_s24 = int_to_ptr.vmem [resolvable:$true] %s167_s24 }
   0xa   : > { %s965_s21 = scalar_select %p840_p5, 1, 0 }
   0xb   : > { %p601_p7 = pneg %p844_p6  ;;  %s675_s25 = scalar_lea.vmem %s168_s24, 256 }
   0xc   : > { %p676_p10 = scmp.ne.s32.totalorder %s168_s24, %s675_s25  ;;  %p683_p13 = scmp.lt.s32.totalorder %s168_s24, %s168_s24 }
   0xd   : > { %p602_p8 = pnand %p601_p7, %p828_p1  ;;  %p684_p0 = scmp.lt.s32.totalorder %s675_s25, %s675_s25 }
   0xf   : > { %p666_p9 = pneg %p602_p8  ;;  %p685_p5 = por %p684_p0, %p683_p13 }
  0x11   : > { %p678_p11 = pnand %p676_p10, %p666_p9 }
  0x13   : > { %p679_p12 = pneg %p678_p11 }
  0x15   : > { %p686_p3 = pnand %p685_p5, %p679_p12 }
  0x17   : > { %689 = shalt.err (!%p686_p3)
}
  0x18   : > { %s775_s26 = smov 128   ;;  %s776_s27 = smov 8  }
  0x19   : > { %604 = dma.hbm_to_vmem [thread:$0]  (!%p602_p8), %s958_s0, 256, %s168_s24, [#allocation3], %s775_s26, %s775_s26, %s776_s27  }
  0x1a   : > { %s32_s30 = sadd.s32 1, %s768_s16  ;;  %s73_s4 = sadd.s32 1, %s760_s14 }
  0x1b   : > { %p34_p4 = scmp.ge.s32.totalorder %s32_s30, 2  ;;  %p80_p5 = scmp.ne.s32.totalorder %s760_s14, %s756_s13 }
  0x1c   : > { %p81_p7 = scmp.eq.s32.totalorder %s772_s17, 0  ;;  %p610_p9 = scmp.lt.s32.totalorder %s772_s17, 2 }
  0x1d   : > { %s976_s30 = smov (%p34_p4, %s32_s30), 0  ;;  %p868_p11 = por %p832_p2, %p80_p5 }
  0x1e   : > { %p82_p10 = por %p81_p7, %p80_p5  ;;  %s68_s6 = ssub.s32 %s768_s16, %s976_s30 }
  0x1f   : > { %s181_s7 = sand.u32 1, %s760_s14   ;;  %p71_p12 = scmp.eq.s32.totalorder %s68_s6, 0 }
  0x20   : > { %s529_s8 = sshll.u32 %s181_s7, 7  ;;  %s541_s9 = sshll.u32 %s768_s16, 11 }
  0x21   : > { %s877_s10 = scalar_select %p71_p12, %s760_s14, %s73_s4  }
  0x22   : > { %s192_s18 = scalar_lea.hbm %s959_s1, %s541_s9  ;;  %s185_s23 = scalar_lea.vmem [#allocation4], %s529_s8 }
  0x23   : > { %s193_s24 = sshll.u32 %s185_s23, 4  ;;  %p884_p8 = pnand %p610_p9, %p82_p10  ;;  %s194_s24 = int_to_ptr.vmem [resolvable:$true] %s193_s24 }
  0x24   : > { %s182_s25 = scalar_lea.sflag [#allocation5], %s181_s7  ;;  %s703_s28 = scalar_lea.vmem %s194_s24, 2048 }
  0x25   : > { %p692_p2 = pneg %p884_p8  ;;  %p704_p13 = scmp.ne.s32.totalorder %s194_s24, %s703_s28 }
  0x26   : > { %s777_s29 = smov [#allocation4]  }
  0x27   : > { %p706_p0 = pnand %p704_p13, %p692_p2  ;;  %s708_s4 = sshll.u32 %s777_s29, 4  ;;  %s709_s4 = int_to_ptr.vmem [resolvable:$false] %s708_s4 }
  0x28   : > { %s710_s6 = scalar_lea.vmem %s709_s4, 4096  ;;  %p711_p4 = scmp.lt.s32.totalorder %s194_s24, %s709_s4 }
  0x29   : > { %p707_p3 = pneg %p706_p0  ;;  %p712_p5 = scmp.lt.s32.totalorder %s710_s6, %s703_s28 }
  0x2b   : > { %p713_p7 = por %p712_p5, %p711_p4 }
  0x2d   : > { %p714_p9 = pnand %p713_p7, %p707_p3 }
  0x2f   : > { %717 = shalt.err (!%p714_p9)
}
  0x30   : > { %608 = dma.hbm_to_vmem [thread:$0]  (!%p884_p8), %s192_s18, 2048, %s194_s24, %s182_s25, %s775_s26, %s775_s26, %s776_s27  }
  0x31   : > { %211 = sbr.rel (%p844_p6) target bundleno = 330 (0x14a), region = 32 }
  0x36   : > { %743 = dma.done.wait (%p828_p1), [#allocation3], 256  }
  0x37   : > { %745 = vsyncadd (%p828_p1), [#allocation3], 4294967040  ;;  %s902_s7 = sand.u32 1, %s756_s13   ;;  %p969_p10 = scmp.ne.s32.totalorder %s965_s21, 0 }
  0x38   : > { %s534_s8 = sshll.u32 %s902_s7, 7  ;;  %s218_s9 = scalar_lea.sflag [#allocation5], %s902_s7 }
  0x39   : > { %s906_s11 = scalar_lea.vmem [#allocation4], %s534_s8 }
  0x3a   : > { %747 = dma.done.wait (%p969_p10), %s218_s9, 2048  }
  0x3b   : > { %749 = vsyncadd (%p969_p10), %s218_s9, 4294965248  ;;  %v277_v0 = vld [vmem:[%s906_s11 + $0x78] sm:$0xff]  ;;  %v276_v1 = vld [vmem:[%s906_s11 + $0x70] sm:$0xff]  ;;  %p248_p1 = scmp.lt.s32.totalorder %s764_s15, 1  ;;  %s535_s27 = sshll.u32 %s902_s7, 4 }
  0x3c   : > { %560 = vmatprep.subr.mxu0 %v277_v0  ;;  %v275_v2 = vld [vmem:[%s906_s11 + $0x68] sm:$0xff]  ;;  %v260_v3 = vld [vmem:[#allocation2] sm:$0xff]  ;;  %v274_v4 = vld [vmem:[%s906_s11 + $0x60] sm:$0xff]  ;;  %s245_s12 = scalar_lea.vmem [#allocation6], %s535_s27  ;;  %s538_s18 = sshll.u32 (%p868_p11), %s764_s15, 3 }
  0x3d   : > { %561 = vmatpush3.xpose.msra.mxu0 %v277_v0  ;;  %592 = vmatprep.mubr.f32.mxu0 %v260_v3  ;;  %v273_v5 = vld [vmem:[%s906_s11 + $0x58] sm:$0xff]  ;;  %v272_v6 = vld [vmem:[%s906_s11 + $0x50] sm:$0xff]  ;;  %v271_v7 = vld [vmem:[%s906_s11 + $0x48] sm:$0xff]  ;;  %s249_s19 = scalar_select %p248_p1, %s764_s15, 1 }
  0x3e   : > { %562 = vmatprep.subr.mxu0 %v276_v1  ;;  %v270_v8 = vld [vmem:[%s906_s11 + $0x40] sm:$0xff]  ;;  %v269_v9 = vld [vmem:[%s906_s11 + $0x38] sm:$0xff]  ;;  %v268_v10 = vld [vmem:[%s906_s11 + $0x30] sm:$0xff]  ;;  %s384_s20 = scalar_lea.vmem (%p868_p11), %s961_s3, %s538_s18 }
  0x3f   : > { %v267_v11 = vld [vmem:[%s906_s11 + $0x28] sm:$0xff]  ;;  %v266_v12 = vld [vmem:[%s906_s11 + $0x20] sm:$0xff]  ;;  %v265_v13 = vld [vmem:[%s906_s11 + $0x18] sm:$0xff]  ;;  %s250_s26 = scalar_lea.vmem %s960_s2, %s249_s19 }
  0x40   : > { %v264_v14 = vld [vmem:[%s906_s11 + $0x10] sm:$0xff]  ;;  %v263_v15 = vld [vmem:[%s906_s11 + $0x8] sm:$0xff]  ;;  %v262_v16 = vld [vmem:[%s906_s11] sm:$0xff] }
  0x41   : > { %563 = vmatpush3.xpose.msra.mxu0 %v276_v1  ;;  %v261_v17 = vld [vmem:[#allocation2 + $0x8] sm:$0xff]  ;;  %v536_v19 = vld [vmem:[%s250_s26] ss:$0 sm:$0xff] }
  0x42   : > { %564 = vmatprep.subr.mxu0 %v275_v2 }
  0x45   : > { %565 = vmatpush3.xpose.msra.mxu0 %v275_v2 }
  0x46   : > { %566 = vmatprep.subr.mxu0 %v274_v4 }
  0x49   : > { %567 = vmatpush3.xpose.msra.mxu0 %v274_v4 }
  0x4a   : > { %568 = vmatprep.subr.mxu0 %v273_v5 }
  0x4d   : > { %569 = vmatpush3.xpose.msra.mxu0 %v273_v5 }
  0x4e   : > { %570 = vmatprep.subr.mxu0 %v272_v6 }
  0x51   : > { %571 = vmatpush3.xpose.msra.mxu0 %v272_v6 }
  0x52   : > { %572 = vmatprep.subr.mxu0 %v271_v7 }
  0x55   : > { %573 = vmatpush3.xpose.msra.mxu0 %v271_v7 }
  0x56   : > { %574 = vmatprep.subr.mxu0 %v270_v8 }
  0x59   : > { %575 = vmatpush3.xpose.msra.mxu0 %v270_v8 }
  0x5a   : > { %576 = vmatprep.subr.mxu0 %v269_v9 }
  0x5d   : > { %577 = vmatpush3.xpose.msra.mxu0 %v269_v9 }
  0x5e   : > { %578 = vmatprep.subr.mxu0 %v268_v10 }
  0x61   : > { %579 = vmatpush3.xpose.msra.mxu0 %v268_v10 }
  0x62   : > { %580 = vmatprep.subr.mxu0 %v267_v11 }
  0x65   : > { %581 = vmatpush3.xpose.msra.mxu0 %v267_v11 }
  0x66   : > { %582 = vmatprep.subr.mxu0 %v266_v12 }
  0x69   : > { %583 = vmatpush3.xpose.msra.mxu0 %v266_v12 }
  0x6a   : > { %584 = vmatprep.subr.mxu0 %v265_v13 }
  0x6d   : > { %585 = vmatpush3.xpose.msra.mxu0 %v265_v13 }
  0x6e   : > { %586 = vmatprep.subr.mxu0 %v264_v14 }
  0x71   : > { %587 = vmatpush3.xpose.msra.mxu0 %v264_v14 }
  0x72   : > { %588 = vmatprep.subr.mxu0 %v263_v15 }
  0x75   : > { %589 = vmatpush3.xpose.msra.mxu0 %v263_v15 }
  0x76   : > { %590 = vmatprep.subr.mxu0 %v262_v16 }
  0x79   : > { %591 = vmatpush3.xpose.msra.mxu0 %v262_v16 }
  0x7c   : > { %593 = vmatmul.mubr.f32.vlgmr.msra.gmra.mxu0 %v261_v17 }
 0x13c   : > { %v594_v18 = vpop.f32.mrf.mxu0 }
 0x13d   : > { %v370_v21 = vadd.f32 %v594_v18, %v536_v19  ;;  %379 = sbr.rel (!%p868_p11) target bundleno = 330 (0x14a), region = 52 }
 0x13e   : > { %v344_v20 = vpop.f32.mrf.mxu0 }
 0x13f   : > { %372 = vst [vmem:[%s245_s12 + $0x8] sm:$0xff] %v370_v21  ;;  %v369_v22 = vadd.f32 %v536_v19, %v344_v20 }
 0x141   : > { %371 = vst [vmem:[%s245_s12] sm:$0xff] %v369_v22 }
 0x146   : > { %v417_v24 = vld [vmem:[%s245_s12 + $0x8] sm:$0xff] }
 0x147   : > { %418 = vst [vmem:[%s384_s20 + $0x10] sm:$0xff] %v417_v24 }
 0x148   : > { %v415_v23 = vld [vmem:[%s245_s12] sm:$0xff] }
 0x149   : > { %416 = vst [vmem:[%s384_s20] sm:$0xff] %v415_v23 }
 0x14a PF: > { %s17_s17 = sadd.s32 1, %s772_s17   ;;  %s970_s12 = smov %s756_s13 }
 0x14b   : > { %p14_p6 = scmp.ge.s32.totalorder %s17_s17, 4   ;;  %s971_s13 = smov %s760_s14 }
 0x14c   : > { %s972_s14 = smov %s877_s10  ;;  %s973_s15 = smov %s768_s16 }
 0x14d   : > { %s974_s16 = smov %s976_s30  ;;  %16 = sbr.rel (!%p14_p6) target bundleno = 5 (0x5), region = 127 }
 0x152   :  { %434 = vsyncpa [#allocation3], 1 }
 0x153   :  { %436 = vsyncpa [#allocation3 + $0x1], 1 }
 0x154   :  { %437 = vsyncpa [#allocation5], 1 }
 0x155   :  { %439 = vsyncpa [#allocation5 + $0x1], 1 }

</bundles_post_ra>
